<compile_context>
chip_gen: v7x
topology: tpu7x:2x2x1
jax: 0.10.0
libtpu: 0.0.40
codegen_flags: <defaults>
</compile_context>

<pallas_src>
import functools

import jax
import jax.numpy as jnp
from jax.experimental import pallas as pl
from jax.experimental.pallas import tpu as pltpu

HIDDEN = 64      # fixed by the module: nn.Linear(y_embedding, 64)
LANE = 128
SUBLANE = 8
TB_MAX = 256     # batch tile upper bound (multiple of 128)


def _round_up(n, m):
    return ((n + m - 1) // m) * m


def _mlp_kernel(seed_ref, x_ref, w1_ref, b1_ref, w2_ref, b2_ref, o_ref,
                *, p_dropout, training):
    # x_ref: (tb, d_in_p) bf16/f32; weights pre-transposed to (in, out) + padded.
    h = jnp.dot(x_ref[...], w1_ref[...],
                preferred_element_type=jnp.float32) + b1_ref[...]
    # Keep elementwise math in f32; cast only at the MXU input (v5e-friendly).
    h = h.astype(w2_ref.dtype)
    y = jnp.dot(h, w2_ref[...],
                preferred_element_type=jnp.float32) + b2_ref[...]

    if training and p_dropout > 0.0:
        # Inverted dropout using the TPU hardware PRNG (per-tile seed).
        pltpu.prng_seed(seed_ref[0] + pl.program_id(0))
        bits = pltpu.bitcast(pltpu.prng_random_bits(y.shape), jnp.uint32)
        keep = bits >= jnp.uint32(int(p_dropout * (2.0 ** 32)))
        y = jnp.where(keep, y * (1.0 / (1.0 - p_dropout)), 0.0)

    o_ref[...] = y.astype(o_ref.dtype)


@functools.partial(
    jax.jit,
    static_argnames=("p_dropout", "training", "tb_max", "use_bf16"))
def autoencoder_forward(x, params, seed=0, *, p_dropout=0.1, training=False,
                        tb_max=TB_MAX, use_bf16=True):
    """x: (B, y_embedding) f32. params in torch layout: (w1,b1,w2,b2) with
    w (out, in) and b (out,). Returns (B, y_embedding // 2) f32."""
    w1, b1, w2, b2 = params
    B, d_in = x.shape
    assert w1.shape == (HIDDEN, d_in)
    d_out = w2.shape[0]
    assert w2.shape == (d_out, HIDDEN)

    # Lane-dense padded dims.
    d_in_p = _round_up(d_in, LANE)
    d_h_p = _round_up(HIDDEN, LANE)
    d_out_p = _round_up(d_out, LANE)

    # Batch tiling: pad instead of asserting divisibility.
    tb = min(tb_max, _round_up(B, SUBLANE))
    b_pad = _round_up(B, tb)
    grid = (b_pad // tb,)

    mm_dtype = jnp.bfloat16 if use_bf16 else jnp.float32

    # Zero-padded, pre-transposed, pre-cast operands (layout plumbing only).
    x_p = jnp.zeros((b_pad, d_in_p), mm_dtype).at[:B, :d_in].set(
        x.astype(mm_dtype))
    w1_p = jnp.zeros((d_in_p, d_h_p), mm_dtype).at[:d_in, :HIDDEN].set(
        w1.T.astype(mm_dtype))
    b1_p = jnp.zeros((1, d_h_p), jnp.float32).at[:, :HIDDEN].set(
        b1.astype(jnp.float32))
    w2_p = jnp.zeros((d_h_p, d_out_p), mm_dtype).at[:HIDDEN, :d_out].set(
        w2.T.astype(mm_dtype))
    b2_p = jnp.zeros((1, d_out_p), jnp.float32).at[:, :d_out].set(
        b2.astype(jnp.float32))

    seed_arr = jnp.full((1,), seed, jnp.int32)

    # Constant index maps: params DMA'd once, resident in VMEM for all steps.
    param_specs = [
        pl.BlockSpec((d_in_p, d_h_p), lambda i, s: (0, 0)),
        pl.BlockSpec((1, d_h_p), lambda i, s: (0, 0)),
        pl.BlockSpec((d_h_p, d_out_p), lambda i, s: (0, 0)),
        pl.BlockSpec((1, d_out_p), lambda i, s: (0, 0)),
    ]

    kernel = functools.partial(_mlp_kernel, p_dropout=p_dropout,
                               training=training)

    y_p = pl.pallas_call(
        kernel,
        out_shape=jax.ShapeDtypeStruct((b_pad, d_out_p), jnp.float32),
        grid_spec=pltpu.PrefetchScalarGridSpec(
            num_scalar_prefetch=1,
            grid=grid,
            in_specs=[pl.BlockSpec((tb, d_in_p), lambda i, s: (i, 0))]
                     + param_specs,
            out_specs=pl.BlockSpec((tb, d_out_p), lambda i, s: (i, 0)),
        ),
        compiler_params=pltpu.CompilerParams(
            dimension_semantics=("parallel",)),
    )(seed_arr, x_p, w1_p, b1_p, w2_p, b2_p)

    return y_p[:B, :d_out]


def init_params(key, y_embedding):
    """PyTorch nn.Linear default init (uniform +-1/sqrt(fan_in)), torch layout."""
    d_in = y_embedding
    d_out = y_embedding // 2
    k1, k2, k3, k4 = jax.random.split(key, 4)
    a1 = d_in ** -0.5
    a2 = HIDDEN ** -0.5
    w1 = jax.random.uniform(k1, (HIDDEN, d_in), jnp.float32, -a1, a1)
    b1 = jax.random.uniform(k2, (HIDDEN,), jnp.float32, -a1, a1)
    w2 = jax.random.uniform(k3, (d_out, HIDDEN), jnp.float32, -a2, a2)
    b2 = jax.random.uniform(k4, (d_out,), jnp.float32, -a2, a2)
    return (w1, b1, w2, b2)


def reference_forward(x, params):
    """Pure-JAX eval-mode reference (Dropout is identity at inference)."""
    w1, b1, w2, b2 = params
    h = x @ w1.T + b1
    return h @ w2.T + b2


if __name__ == "__main__":
    key = jax.random.PRNGKey(0)
    kx, kp = jax.random.split(key)

    # Small shapes consistent with the module; intentionally non-128/non-8
    # multiples so both lane padding and batch padding are exercised.
    y_embedding = 200          # embedding.shape[1]
    B = 20
    x = jax.random.uniform(kx, (B, y_embedding), jnp.float32)
    params = init_params(kp, y_embedding)

    # Default path (single large batch tile).
    y = autoencoder_forward(x, params)
    jax.block_until_ready(y)

    y_ref = reference_forward(x, params)
    assert y.shape == (B, y_embedding // 2)
    assert jnp.allclose(y, y_ref, atol=2e-2, rtol=2e-2), \
        float(jnp.max(jnp.abs(y - y_ref)))

    # Multi-step grid path (tb=8 -> 3 pipelined grid steps).
    y2 = autoencoder_forward(x, params, tb_max=8)
    jax.block_until_ready(y2)
    assert jnp.allclose(y2, y_ref, atol=2e-2, rtol=2e-2)

    # TODO(synk): training-mode dropout uses the TPU hardware PRNG, so it cannot
    # reproduce torch's RNG stream bit-for-bit (eval mode is exact up to bf16).

    print("KERNEL_OK")
</pallas_src>

<mosaic_0001>
module attributes {stable_mosaic.version = 11 : i64} {
  func.func @_mlp_kernel(%arg0: i32, %arg1: memref<1xi32, #tpu.memory_space<smem>>, %arg2: memref<24x256xbf16, #tpu.memory_space<vmem>>, %arg3: memref<256x128xbf16, #tpu.memory_space<vmem>>, %arg4: memref<1x128xf32, #tpu.memory_space<vmem>>, %arg5: memref<128x128xbf16, #tpu.memory_space<vmem>>, %arg6: memref<1x128xf32, #tpu.memory_space<vmem>>, %arg7: memref<24x128xf32, #tpu.memory_space<vmem>>) attributes {dimension_semantics = [#tpu.dimension_semantics<parallel>], iteration_bounds = array<i64: 1>, scalar_prefetch = 1 : i64, scratch_operands = 0 : i64, tpu.core_type = #tpu.core_type<tc>, window_params = [{transform_indices = @transform_0, window_bounds = array<i64: 24, 256>}, {pipeline_mode = #tpu.pipeline_mode<synchronous>, transform_indices = @transform_1, window_bounds = array<i64: 256, 128>}, {pipeline_mode = #tpu.pipeline_mode<synchronous>, transform_indices = @transform_2, window_bounds = array<i64: 1, 128>}, {pipeline_mode = #tpu.pipeline_mode<synchronous>, transform_indices = @transform_3, window_bounds = array<i64: 128, 128>}, {pipeline_mode = #tpu.pipeline_mode<synchronous>, transform_indices = @transform_4, window_bounds = array<i64: 1, 128>}, {transform_indices = @transform_5, window_bounds = array<i64: 24, 128>}]} {
    %c0 = arith.constant 0 : index
    %c0_0 = arith.constant 0 : index
    %0 = vector.load %arg2[%c0, %c0_0] : memref<24x256xbf16, #tpu.memory_space<vmem>>, vector<24x256xbf16>
    %c0_1 = arith.constant 0 : index
    %c0_2 = arith.constant 0 : index
    %1 = vector.load %arg3[%c0_1, %c0_2] : memref<256x128xbf16, #tpu.memory_space<vmem>>, vector<256x128xbf16>
    %cst = arith.constant dense<0.000000e+00> : vector<24x128xf32>
    %2 = tpu.matmul %0, %1, %cst {dimension_numbers = #tpu.dot_dimension_numbers<[1], [0], [0], [1], [0, 0, 1, 1], [], []>} : vector<24x256xbf16>, vector<256x128xbf16>, vector<24x128xf32> -> vector<24x128xf32>
    %c0_3 = arith.constant 0 : index
    %c0_4 = arith.constant 0 : index
    %3 = vector.load %arg4[%c0_3, %c0_4] : memref<1x128xf32, #tpu.memory_space<vmem>>, vector<1x128xf32>
    %4 = vector.broadcast %3 : vector<1x128xf32> to vector<24x128xf32>
    %5 = arith.addf %2, %4 : vector<24x128xf32>
    %6 = arith.truncf %5 : vector<24x128xf32> to vector<24x128xbf16>
    %c0_5 = arith.constant 0 : index
    %c0_6 = arith.constant 0 : index
    %7 = vector.load %arg5[%c0_5, %c0_6] : memref<128x128xbf16, #tpu.memory_space<vmem>>, vector<128x128xbf16>
    %cst_7 = arith.constant dense<0.000000e+00> : vector<24x128xf32>
    %8 = tpu.matmul %6, %7, %cst_7 {dimension_numbers = #tpu.dot_dimension_numbers<[1], [0], [0], [1], [0, 0, 1, 1], [], []>} : vector<24x128xbf16>, vector<128x128xbf16>, vector<24x128xf32> -> vector<24x128xf32>
    %c0_8 = arith.constant 0 : index
    %c0_9 = arith.constant 0 : index
    %9 = vector.load %arg6[%c0_8, %c0_9] : memref<1x128xf32, #tpu.memory_space<vmem>>, vector<1x128xf32>
    %10 = vector.broadcast %9 : vector<1x128xf32> to vector<24x128xf32>
    %11 = arith.addf %8, %10 : vector<24x128xf32>
    %c0_10 = arith.constant 0 : index
    %c0_11 = arith.constant 0 : index
    %12 = vector.load %arg7[%c0_10, %c0_11] : memref<24x128xf32, #tpu.memory_space<vmem>>, vector<24x128xf32>
    tpu.vector_store %arg7[%c0_10, %c0_11], %11 {strides = array<i32>} : memref<24x128xf32, #tpu.memory_space<vmem>>, vector<24x128xf32>,
    return
  }
  func.func @transform_0(%arg0: i32, %arg1: memref<1xi32, #tpu.memory_space<smem>>) -> (i32, i32) {
    %c0_i32 = arith.constant 0 : i32
    %c0_i32_0 = arith.constant 0 : i32
    return %arg0, %c0_i32 : i32, i32
  }
  func.func @transform_1(%arg0: i32, %arg1: memref<1xi32, #tpu.memory_space<smem>>) -> (i32, i32) {
    %c0_i32 = arith.constant 0 : i32
    %c0_i32_0 = arith.constant 0 : i32
    %c0_i32_1 = arith.constant 0 : i32
    return %c0_i32, %c0_i32_0 : i32, i32
  }
  func.func @transform_2(%arg0: i32, %arg1: memref<1xi32, #tpu.memory_space<smem>>) -> (i32, i32) {
    %c0_i32 = arith.constant 0 : i32
    %c0_i32_0 = arith.constant 0 : i32
    %c0_i32_1 = arith.constant 0 : i32
    return %c0_i32, %c0_i32_0 : i32, i32
  }
  func.func @transform_3(%arg0: i32, %arg1: memref<1xi32, #tpu.memory_space<smem>>) -> (i32, i32) {
    %c0_i32 = arith.constant 0 : i32
    %c0_i32_0 = arith.constant 0 : i32
    %c0_i32_1 = arith.constant 0 : i32
    return %c0_i32, %c0_i32_0 : i32, i32
  }
  func.func @transform_4(%arg0: i32, %arg1: memref<1xi32, #tpu.memory_space<smem>>) -> (i32, i32) {
    %c0_i32 = arith.constant 0 : i32
    %c0_i32_0 = arith.constant 0 : i32
    %c0_i32_1 = arith.constant 0 : i32
    return %c0_i32, %c0_i32_0 : i32, i32
  }
  func.func @transform_5(%arg0: i32, %arg1: memref<1xi32, #tpu.memory_space<smem>>) -> (i32, i32) {
    %c0_i32 = arith.constant 0 : i32
    %c0_i32_0 = arith.constant 0 : i32
    return %arg0, %c0_i32 : i32, i32
  }
}

</mosaic_0001>

<bundles_post_ra>
// kernel: autoencoder_forward.1
= control target key start
LH: loop header
LB: loop body
LE: loop exit
PB: predicated region body
PF: predicated region fallthrough
CT: control target
= control target key end

     0   :  { %s648_s0 = inlined_call_operand.<no memory space> [shape: s32[1], index: 0, kind: input, shape index: {}]   ;;  %s649_s1 = inlined_call_operand.vmem [shape: bf16[24,256], index: 1, kind: input, shape index: {}]   ;;  %s650_s2 = inlined_call_operand.vmem [shape: bf16[256,128], index: 2, kind: input, shape index: {}]   ;;  %s651_s3 = inlined_call_operand.vmem [shape: f32[1,128], index: 3, kind: input, shape index: {}]   ;;  %s652_s4 = inlined_call_operand.vmem [shape: bf16[128,128], index: 4, kind: input, shape index: {}]   ;;  %s653_s5 = inlined_call_operand.vmem [shape: f32[1,128], index: 5, kind: input, shape index: {}]   ;;  %s654_s6 = inlined_call_operand.hbm [shape: f32[24,128], index: 6, kind: output, shape index: {}]  }
   0x1   :  { %v458_v0 = vld [vmem:[%s650_s2 + $0x40] sm:$0xff]   ;;  %v460_v2 = vld [vmem:[%s650_s2 + $0x48] sm:$0xff]   ;;  %v462_v4 = vld [vmem:[%s650_s2 + $0x50] sm:$0xff]  }
   0x2   :  { %v459_v1 = vld [vmem:[%s650_s2] sm:$0xff]   ;;  %397 = vmatprep.subr.bf16.mxu0 %v458_v0  ;;  %v461_v3 = vld [vmem:[%s650_s2 + $0x8] sm:$0xff]   ;;  %v463_v5 = vld [vmem:[%s650_s2 + $0x10] sm:$0xff]  }
   0x3   :  { %398 = vmatpush3.bf16.msra.mxu0 %v459_v1  ;;  %v464_v6 = vld [vmem:[%s650_s2 + $0x58] sm:$0xff]   ;;  %v466_v8 = vld [vmem:[%s650_s2 + $0x60] sm:$0xff]   ;;  %v468_v10 = vld [vmem:[%s650_s2 + $0x68] sm:$0xff]  }
   0x4   :  { %399 = vmatprep.subr.bf16.mxu0 %v460_v2  ;;  %v465_v7 = vld [vmem:[%s650_s2 + $0x18] sm:$0xff]   ;;  %v467_v9 = vld [vmem:[%s650_s2 + $0x20] sm:$0xff]   ;;  %v469_v11 = vld [vmem:[%s650_s2 + $0x28] sm:$0xff]  }
   0x5   :  { %v476_v12 = vld [vmem:[%s649_s1 + $0x4] ss:$8 sps:$4 sm:$0xff]   ;;  %v470_v15 = vld [vmem:[%s650_s2 + $0x70] sm:$0xff]   ;;  %v472_v18 = vld [vmem:[%s650_s2 + $0x78] sm:$0xff]  }
   0x6   :  { %v479_v13 = vld [vmem:[%s652_s4] sm:$0xff]   ;;  %211 = vmatprep.mubr.bf16.mxu0 %v476_v12  ;;  %v480_v14 = vld [vmem:[%s652_s4 + $0x8] sm:$0xff]   ;;  %v471_v16 = vld [vmem:[%s650_s2 + $0x30] sm:$0xff]  }
   0x7   :  { %400 = vmatpush3.bf16.msra.mxu0 %v461_v3  ;;  %435 = vmatprep.subr.bf16.mxu1 %v479_v13  ;;  %v481_v17 = vld [vmem:[%s652_s4 + $0x10] sm:$0xff]  }
   0x8   :  { %401 = vmatprep.subr.bf16.mxu0 %v462_v4  ;;  %436 = vmatpush3.bf16.msra.mxu1 %v479_v13 }
   0x9   :  { %437 = vmatprep.subr.bf16.mxu1 %v480_v14 }
   0xb   :  { %402 = vmatpush3.bf16.msra.mxu0 %v463_v5 }
   0xc   :  { %403 = vmatprep.subr.bf16.mxu0 %v464_v6 }
   0xf   :  { %404 = vmatpush3.bf16.msra.mxu0 %v465_v7 }
  0x10   :  { %405 = vmatprep.subr.bf16.mxu0 %v466_v8 }
  0x13   :  { %406 = vmatpush3.bf16.msra.mxu0 %v467_v9 }
  0x14   :  { %407 = vmatprep.subr.bf16.mxu0 %v468_v10 }
  0x17   :  { %408 = vmatpush3.bf16.msra.mxu0 %v469_v11 }
  0x18   :  { %409 = vmatprep.subr.bf16.mxu0 %v470_v15 }
  0x19   :  { %12 = vsyncpa [#allocation5], 0  ;;  %438 = vmatpush3.bf16.msra.mxu1 %v480_v14  ;;  %v482_v19 = vld [vmem:[%s652_s4 + $0x18] sm:$0xff]   ;;  %v26_v21 = vld [vmem:[%s649_s1 + $0x10] sm:$0xff]  ;;  %s511_s25 = smov [#allocation4]  }
  0x1a   :  { %439 = vmatprep.subr.bf16.mxu1 %v481_v17  ;;  %v473_v20 = vld [vmem:[%s650_s2 + $0x38] sm:$0xff]   ;;  %v474_v22 = vld [vmem:[%s649_s1] ss:$8 sps:$4 sm:$0xff]   ;;  %v371_v23 = vcombine.high %v26_v21, %v26_v21  ;;  %v370_v24 = vcombine.low %v26_v21, %v26_v21  ;;  %v485_v27 = vld [vmem:[%s652_s4 + $0x30] sm:$0xff]  }
  0x1b   :  { %410 = vmatpush3.bf16.msra.mxu0 %v471_v16  ;;  %v483_v25 = vld [vmem:[%s652_s4 + $0x20] sm:$0xff]   ;;  %v484_v26 = vld [vmem:[%s652_s4 + $0x28] sm:$0xff]   ;;  %v486_v28 = vld [vmem:[%s652_s4 + $0x38] sm:$0xff]  }
  0x1c   :  { %411 = vmatprep.subr.bf16.mxu0 %v472_v18  ;;  %v367_v34 = vld [vmem:[%s651_s3] ss:$0 sm:$0xff]  ;;  %s356_s3 = sshll.u32 %s511_s25, 4  ;;  %s357_s3 = int_to_ptr.vmem [resolvable:$true] %s356_s3 }
  0x1d   :  { %440 = vmatpush3.bf16.msra.mxu1 %v481_v17  ;;  %v388_v46 = vld [vmem:[%s653_s5] ss:$0 sm:$0xff]  ;;  %s487_s26 = scalar_lea.vmem %s357_s3, 384  ;;  %p492_p1 = scmp.lt.s32.totalorder %s357_s3, %s357_s3 }
  0x1e   :  { %441 = vmatprep.subr.bf16.mxu1 %v482_v19  ;;  %p488_p0 = scmp.ne.s32.totalorder %s357_s3, %s487_s26  ;;  %p493_p2 = scmp.lt.s32.totalorder %s487_s26, %s487_s26 }
  0x1f   :  { %412 = vmatpush3.bf16.msra.mxu0 %v473_v20 }
  0x20   :  { %p494_p3 = por %p493_p2, %p492_p1 }
  0x21   :  { %442 = vmatpush3.bf16.msra.mxu1 %v482_v19 }
  0x22   :  { %212 = vmatmul.mubr.bf16.vlgmr.msra.gmra.mrb[0].mxu0 %v474_v22  ;;  %443 = vmatprep.subr.bf16.mxu1 %v483_v25  ;;  %p495_p4 = pnand %p494_p3, %p488_p0 }
  0x23   :  { %219 = vmatprep.mubr.bf16.mxu0 %v371_v23 }
  0x25   :  { %444 = vmatpush3.bf16.msra.mxu1 %v483_v25 }
  0x26   :  { %445 = vmatprep.subr.bf16.mxu1 %v484_v26 }
  0x29   :  { %446 = vmatpush3.bf16.msra.mxu1 %v484_v26 }
  0x2a   :  { %220 = vmatmul.mubr.bf16.gmra.mrb[4].mxu0 %v370_v24  ;;  %447 = vmatprep.subr.bf16.mxu1 %v485_v27 }
  0x2d   :  { %448 = vmatpush3.bf16.msra.mxu1 %v485_v27 }
  0x2e   :  { %449 = vmatprep.subr.bf16.mxu1 %v486_v28 }
  0x31   :  { %450 = vmatpush3.bf16.msra.mxu1 %v486_v28 }
  0xf5   :  { %v413_v29 = vpop.f32.mrb[0].mxu0 }
  0xf6   :  { %v414_v30 = vpop.f32.mrb[1].mxu0 }
  0xf7   :  { %v415_v31 = vadd.f32 %v414_v30, %v413_v29  ;;  %v416_v32 = vpop.f32.mrb[2].mxu0 }
  0xf8   :  { %v417_v33 = vpop.f32.mrb[3].mxu0 }
  0xf9   :  { %v418_v35 = vadd.f32 %v417_v33, %v416_v32  ;;  %v214_v36 = vadd.f32 %v415_v31, %v367_v34 }
  0xfb   :  { %v217_v37 = vadd.f32 %v418_v35, %v367_v34 }
  0xfd   :  { %v419_v38 = vpop.f32.mrb[4].mxu0  ;;  %v227_v39 = vpack.c.bf16 %v217_v37, %v214_v36 }
  0xfe   :  { %v420_v40 = vpop.f32.mrb[5].mxu0 }
  0xff   :  { %v421_v41 = vadd.f32 %v420_v40, %v419_v38  ;;  %v422_v42 = vpop.f32.mrb[6].mxu0  ;;  %451 = vmatprep.mubr.bf16.mxu1 %v227_v39 }
 0x100   :  { %v423_v43 = vpop.f32.mrb[7].mxu0 }
 0x101   :  { %v222_v44 = vadd.f32 %v421_v41, %v367_v34 }
 0x103   :  { %v228_v45 = vpack.c.bf16 %v222_v44, %v222_v44 }
 0x105   :  { %452 = vmatmul.mubr.bf16.vlgmr.msra.gmra.mrb[0].mxu1 %v228_v45 }
 0x1d8   :  { %v453_v47 = vpop.f32.mrb[0].mxu1 }
 0x1d9   :  { %v343_v48 = vadd.f32 %v453_v47, %v388_v46  ;;  %v334_v49 = vpop.f32.mrb[1].mxu1 }
 0x1da   :  { %v335_v50 = vadd.f32 %v388_v46, %v334_v49  ;;  %v454_v51 = vpop.f32.mrb[2].mxu1 }
 0x1db   :  { %350 = vst [vmem:[#allocation4 + $0x10] sm:$0xff] %v343_v48  ;;  %v337_v52 = vpop.f32.mrb[3].mxu1 }
 0x1dc   :  { %348 = vst [vmem:[#allocation4] sm:$0xff] %v335_v50  ;;  %v338_v53 = vadd.f32 %v388_v46, %v337_v52 }
 0x1de   :  { %349 = vst [vmem:[#allocation4 + $0x8] sm:$0xff] %v338_v53 }
 0x1df   :  { %498 = shalt.err (!%p495_p4)
}
 0x1e0   :  { %s499_s28 = scalar_lea.hbm %s654_s6, 384 }
 0x1e1   :  { %p500_p5 = scmp.ne.s32.totalorder %s654_s6, %s499_s28  ;;  %p503_p6 = scmp.lt.u32.totalorder %s499_s28, %s654_s6 }
 0x1e3   :  { %p505_p7 = pnand %p503_p6, %p500_p5 }
 0x1e5   :  { %508 = shalt.err (!%p505_p7)
}
 0x1e6   :  { %s512_s9 = smov 128   ;;  %s513_s10 = smov 8  }
 0x1e7   :  { %362 = dma.vmem_to_hbm [thread:$0]  %s357_s3, 384, %s654_s6, [#allocation5], %s512_s9, %s512_s9, %s513_s10  }
 0x1e8   :  { %509 = dma.done.wait [#allocation5], 384  }
 0x1e9   :  { %510 = vsyncadd [#allocation5], 4294966912 }
 0x1ea   :  { %366 = vsyncpa [#allocation5], 1 }

</bundles_post_ra>
